<compile_context>
chip_gen: v7x
topology: tpu7x:2x2x1
jax: 0.10.0
libtpu: 0.0.40
codegen_flags: <defaults>
</compile_context>

<pallas_src>
import math

import jax
import jax.numpy as jnp
from jax.experimental import pallas as pl
from jax.experimental.pallas import tpu as pltpu


def _normalizer_kernel(w_ref, b_ref, x_ref, o_ref):
    # (1, tn) f32 weight/bias broadcast over a (tm, tn) x tile; pure VPU FMA.
    x = x_ref[...].astype(jnp.float32)
    o_ref[...] = (w_ref[...] * x + b_ref[...]).astype(o_ref.dtype)


def _vmem_capacity_bytes():
    """Best-effort per-TensorCore VMEM capacity; None if unavailable."""
    try:
        info = pltpu.get_tpu_info()
        return int(info.vmem_capacity_bytes)
    except Exception:
        return None


def normalizer_forward(x, weight_diag, bias, *, vmem_budget_bytes=None,
                       donate_x=False):
    """y = weight_diag * x + bias, per-feature broadcast over batch rows."""
    N, d = x.shape
    out_dtype = x.dtype

    # --- generation-aware VMEM budgets -------------------------------------
    vmem_cap = _vmem_capacity_bytes()
    small_vmem = (vmem_cap is None) or (vmem_cap <= 64 * 1024 * 1024)  # v7x-class
    if vmem_budget_bytes is None:
        vmem_budget_bytes = (16 if small_vmem else 32) * 1024 * 1024
    limit_cap = 48 * 1024 * 1024 if small_vmem else 64 * 1024 * 1024

    # --- lane packing: make the kernel's last dim a multiple of 128 ---------
    # reshape (N, d) -> (N//r, r*d) concatenates r consecutive rows; tiling the
    # per-feature weight/bias r times preserves the broadcast semantics exactly.
    # r = 128 / gcd(d, 128)  =>  dl = lcm(d, 128)  (lane-dense, unmasked stores).
    r = 1
    if d % 128 != 0:
        r_cand = 128 // math.gcd(d, 128)
        if N % r_cand == 0:
            r = r_cand
        # else: fall back to the masked-lane layout (correct, slower stores).
    Np, dl = N // r, d * r
    xp = x.reshape(Np, dl)
    w2 = jnp.tile(weight_diag.astype(jnp.float32).reshape(1, d), (1, r))
    b2 = jnp.tile(bias.astype(jnp.float32).reshape(1, d), (1, r))

    # --- tile sizing: large lane-dense blocks under a conservative VMEM budget
    # (double-buffered x input + double-buffered output ~= 2*tm*tn*bytes).
    bytes_per_elem = xp.dtype.itemsize + jnp.dtype(out_dtype).itemsize
    budget_elems = max(vmem_budget_bytes // (2 * bytes_per_elem), 8 * 128)

    if dl <= 4096 or dl % 128 != 0:
        tn = dl                      # full feature extent (always a legal block)
    else:
        tn = 2048                    # lane-dense feature tile (multiple of 128)

    # Sublane packing of the in/out dtype (f32 -> 8, bf16 -> 16, int8/fp8 -> 32).
    sub = {4: 8, 2: 16, 1: 32}.get(jnp.dtype(x.dtype).itemsize, 8)

    tm_cap = max(((budget_elems // tn) // sub) * sub, sub)
    if Np <= 2 * sub:
        tm = Np                      # too small to split; full row extent block
    else:
        # Cap at ~Np/2 (sublane-rounded) so the row axis has >= 2 grid steps
        # and megacore can shard this memory-bound stream across both TCs.
        half = max(((Np // 2) // sub) * sub, sub)
        tm = min(tm_cap, half)
    tm = max(tm, 1)

    # Feature axis is the slower grid axis: the (1, tn) weight/bias block index
    # is constant across the inner row loop, so it is not re-DMA'd every step.
    grid = (pl.cdiv(dl, tn), pl.cdiv(Np, tm))

    working_set = 2 * tm * tn * bytes_per_elem + 4 * tn * 4  # + tiny w/b
    vmem_limit = min(max(int(working_set * 1.5), 32 * 1024 * 1024), limit_cap)

    aliases = {2: 0} if donate_x else {}

    yp = pl.pallas_call(
        _normalizer_kernel,
        out_shape=jax.ShapeDtypeStruct((Np, dl), out_dtype),
        grid_spec=pltpu.PrefetchScalarGridSpec(
            num_scalar_prefetch=0,
            grid=grid,
            in_specs=[
                pl.BlockSpec((1, tn), lambda j, i: (0, j)),    # weight_diag (f32)
                pl.BlockSpec((1, tn), lambda j, i: (0, j)),    # bias        (f32)
                pl.BlockSpec((tm, tn), lambda j, i: (i, j)),   # x row/feature tile
            ],
            out_specs=pl.BlockSpec((tm, tn), lambda j, i: (i, j)),
        ),
        compiler_params=pltpu.CompilerParams(
            dimension_semantics=("parallel", "parallel"),
            vmem_limit_bytes=vmem_limit,
        ),
        input_output_aliases=aliases,
    )(w2, b2, xp)
    return yp.reshape(N, d)


def set_weights(x):
    """Equivalent of Normalizer.set_weights: returns (weight_diag, bias)."""
    # TODO(synk): the `weights_set` flag / exception is host-side control flow,
    # not representable in the kernel.
    # NOTE: ddof=1 matches torch.var's default; it is NaN/inf for a single-row
    # fitting batch (same as the PyTorch module).
    m = jnp.mean(x, axis=0)
    v = jnp.var(x, axis=0, ddof=1)
    bias = -m
    weight_diag = 1.0 / jnp.sqrt(v + 1e-8)
    return weight_diag, bias


if __name__ == "__main__":
    key = jax.random.PRNGKey(0)
    kx, kfit, kx2, kfit2, kx3, kfit3, kx4, kfit4 = jax.random.split(key, 8)

    # 1) Small case matching the module's layout (batch rows, features); packed.
    N, d = 8, 32
    x_fit = jax.random.normal(kfit, (N, d), dtype=jnp.float32) * 2.0 + 0.5
    x = jax.random.normal(kx, (N, d), dtype=jnp.float32)
    weight_diag, bias = set_weights(x_fit)
    y = jax.block_until_ready(normalizer_forward(x, weight_diag, bias))
    assert y.shape == x.shape
    assert jnp.allclose(y, weight_diag * x + bias, atol=1e-6, rtol=1e-6)

    # 2) d % 128 == 0 (no packing), multiple row tiles.
    N2, d2 = 512, 256
    x2_fit = jax.random.normal(kfit2, (N2, d2), dtype=jnp.float32) * 3.0 - 1.0
    x2 = jax.random.normal(kx2, (N2, d2), dtype=jnp.float32)
    w2_, b2_ = set_weights(x2_fit)
    y2 = jax.block_until_ready(normalizer_forward(x2, w2_, b2_))
    assert jnp.allclose(y2, w2_ * x2 + b2_, atol=1e-6, rtol=1e-6)

    # 3) Awkward feature size (d=48 -> r=8, dl=384): generalized lane packing.
    N3, d3 = 64, 48
    x3_fit = jax.random.normal(kfit3, (N3, d3), dtype=jnp.float32) * 1.5 + 0.2
    x3 = jax.random.normal(kx3, (N3, d3), dtype=jnp.float32)
    w3_, b3_ = set_weights(x3_fit)
    y3 = jax.block_until_ready(normalizer_forward(x3, w3_, b3_))
    assert jnp.allclose(y3, w3_ * x3 + b3_, atol=1e-6, rtol=1e-6)

    # 4) Feature-tiled path with a partial last feature tile (dl=4224, tn=2048).
    N4, d4 = 32, 4224
    x4_fit = jax.random.normal(kfit4, (N4, d4), dtype=jnp.float32) * 0.7 - 0.3
    x4 = jax.random.normal(kx4, (N4, d4), dtype=jnp.float32)
    w4_, b4_ = set_weights(x4_fit)
    y4 = jax.block_until_ready(normalizer_forward(x4, w4_, b4_))
    assert jnp.allclose(y4, w4_ * x4 + b4_, atol=1e-6, rtol=1e-6)

    print("KERNEL_OK")
</pallas_src>

<mosaic_0001>
module attributes {stable_mosaic.version = 11 : i64} {
  func.func @_normalizer_kernel(%arg0: i32, %arg1: i32, %arg2: memref<1x128xf32, #tpu.memory_space<vmem>>, %arg3: memref<1x128xf32, #tpu.memory_space<vmem>>, %arg4: memref<2x128xf32, #tpu.memory_space<vmem>>, %arg5: memref<2x128xf32, #tpu.memory_space<vmem>>) attributes {dimension_semantics = [#tpu.dimension_semantics<parallel>, #tpu.dimension_semantics<parallel>], iteration_bounds = array<i64: 1, 1>, scalar_prefetch = 0 : i64, scratch_operands = 0 : i64, tpu.core_type = #tpu.core_type<tc>, window_params = [{transform_indices = @transform_0, window_bounds = array<i64: 1, 128>}, {transform_indices = @transform_1, window_bounds = array<i64: 1, 128>}, {transform_indices = @transform_2, window_bounds = array<i64: 2, 128>}, {transform_indices = @transform_3, window_bounds = array<i64: 2, 128>}]} {
    %c0 = arith.constant 0 : index
    %c0_0 = arith.constant 0 : index
    %0 = vector.load %arg4[%c0, %c0_0] : memref<2x128xf32, #tpu.memory_space<vmem>>, vector<2x128xf32>
    %c0_1 = arith.constant 0 : index
    %c0_2 = arith.constant 0 : index
    %1 = vector.load %arg2[%c0_1, %c0_2] : memref<1x128xf32, #tpu.memory_space<vmem>>, vector<1x128xf32>
    %2 = vector.broadcast %1 : vector<1x128xf32> to vector<2x128xf32>
    %3 = arith.mulf %2, %0 : vector<2x128xf32>
    %c0_3 = arith.constant 0 : index
    %c0_4 = arith.constant 0 : index
    %4 = vector.load %arg3[%c0_3, %c0_4] : memref<1x128xf32, #tpu.memory_space<vmem>>, vector<1x128xf32>
    %5 = vector.broadcast %4 : vector<1x128xf32> to vector<2x128xf32>
    %6 = arith.addf %3, %5 : vector<2x128xf32>
    %c0_5 = arith.constant 0 : index
    %c0_6 = arith.constant 0 : index
    %7 = vector.load %arg5[%c0_5, %c0_6] : memref<2x128xf32, #tpu.memory_space<vmem>>, vector<2x128xf32>
    tpu.vector_store %arg5[%c0_5, %c0_6], %6 {strides = array<i32>} : memref<2x128xf32, #tpu.memory_space<vmem>>, vector<2x128xf32>,
    return
  }
  func.func @transform_0(%arg0: i32, %arg1: i32) -> (i32, i32) {
    %c0_i32 = arith.constant 0 : i32
    %c0_i32_0 = arith.constant 0 : i32
    return %c0_i32, %arg0 : i32, i32
  }
  func.func @transform_1(%arg0: i32, %arg1: i32) -> (i32, i32) {
    %c0_i32 = arith.constant 0 : i32
    %c0_i32_0 = arith.constant 0 : i32
    return %c0_i32, %arg0 : i32, i32
  }
  func.func @transform_2(%arg0: i32, %arg1: i32) -> (i32, i32) {
    %c0_i32 = arith.constant 0 : i32
    return %arg1, %arg0 : i32, i32
  }
  func.func @transform_3(%arg0: i32, %arg1: i32) -> (i32, i32) {
    %c0_i32 = arith.constant 0 : i32
    return %arg1, %arg0 : i32, i32
  }
}

</mosaic_0001>

<bundles_post_ra>
// kernel: tpu_custom_call.1
= control target key start
LH: loop header
LB: loop body
LE: loop exit
PB: predicated region body
PF: predicated region fallthrough
CT: control target
= control target key end

     0   :  { %8 = vsyncpa [#allocation3], 0  ;;  %s164_s0 = inlined_call_operand.hbm [shape: f32[1,128], index: 0, kind: input, shape index: {}]   ;;  %s165_s1 = inlined_call_operand.vmem [shape: f32[1,128], index: 1, kind: input, shape index: {}]   ;;  %s166_s2 = inlined_call_operand.vmem [shape: f32[2,128], index: 2, kind: input, shape index: {}]   ;;  %s167_s3 = inlined_call_operand.hbm [shape: f32[2,128], index: 3, kind: output, shape index: {}]  }
   0x1   :  { %9 = vsyncpa [#allocation4], 0  ;;  %s112_s12 = smov [#allocation2]   ;;  %s64_s16 = scalar_lea.hbm %s164_s0, 16 }
   0x2   :  { %s16_s13 = sshll.u32 %s112_s12, 4  ;;  %p65_p0 = scmp.ne.s32.totalorder %s164_s0, %s64_s16  ;;  %s17_s13 = int_to_ptr.vmem [resolvable:$true] %s16_s13 }
   0x3   :  { %p68_p1 = scmp.lt.u32.totalorder %s64_s16, %s164_s0 }
   0x5   :  { %p70_p2 = pnand %p68_p1, %p65_p0 }
   0x7   :  { %73 = shalt.err (!%p70_p2)
}
   0x8   :  { %s74_s21 = scalar_lea.vmem %s17_s13, 16  ;;  %s78_s22 = scalar_lea.vmem %s17_s13, 32 }
   0x9   :  { %p75_p3 = scmp.ne.s32.totalorder %s17_s13, %s74_s21  ;;  %p79_p4 = scmp.lt.s32.totalorder %s17_s13, %s17_s13 }
   0xa   :  { %p80_p5 = scmp.lt.s32.totalorder %s78_s22, %s74_s21 }
   0xc   :  { %p81_p6 = por %p80_p5, %p79_p4 }
   0xe   :  { %p82_p7 = pnand %p81_p6, %p75_p3 }
  0x10   :  { %85 = shalt.err (!%p82_p7)
}
  0x11   :  { %19 = dma.hbm_to_vmem [thread:$0]  %s164_s0, 16, %s17_s13, [#allocation3]  }
  0x12   :  { %108 = dma.done.wait [#allocation3], 16  }
  0x13   :  { %109 = vsyncadd [#allocation3], 4294967280  ;;  %s113_s25 = smov [#allocation5]   ;;  %v27_v0 = vld [vmem:[%s166_s2] sm:$0x3] }
  0x14   :  { %s51_s26 = sshll.u32 %s113_s25, 4  ;;  %v60_v1 = vld [vmem:[#allocation2] ss:$0 sm:$0xff]  ;;  %v61_v2 = vld [vmem:[%s165_s1] ss:$0 sm:$0xff]  ;;  %s52_s26 = int_to_ptr.vmem [resolvable:$true] %s51_s26 }
  0x15   :  { %v35_v3 = vmul.f32 %v60_v1, %v27_v0  ;;  %s86_s4 = scalar_lea.vmem %s52_s26, 32  ;;  %p91_p9 = scmp.lt.s32.totalorder %s52_s26, %s52_s26 }
  0x16   :  { %p87_p8 = scmp.ne.s32.totalorder %s52_s26, %s86_s4  ;;  %p92_p10 = scmp.lt.s32.totalorder %s86_s4, %s86_s4 }
  0x17   :  { %v43_v4 = vadd.f32 %v61_v2, %v35_v3 }
  0x18   :  { %p93_p11 = por %p92_p10, %p91_p9 }
  0x19   :  { %44 = vst [vmem:[#allocation5] sm:$0x3] %v43_v4 }
  0x1a   :  { %p94_p12 = pnand %p93_p11, %p87_p8 }
  0x1c   :  { %97 = shalt.err (!%p94_p12)
}
  0x1d   :  { %s98_s2 = scalar_lea.hbm %s167_s3, 32 }
  0x1e   :  { %p99_p13 = scmp.ne.s32.totalorder %s167_s3, %s98_s2  ;;  %p102_p0 = scmp.lt.u32.totalorder %s98_s2, %s167_s3 }
  0x20   :  { %p104_p1 = pnand %p102_p0, %p99_p13 }
  0x22   :  { %107 = shalt.err (!%p104_p1)
}
  0x23   :  { %54 = dma.vmem_to_hbm [thread:$0]  %s52_s26, 32, %s167_s3, [#allocation4]  }
  0x24   :  { %110 = dma.done.wait [#allocation4], 32  }
  0x25   :  { %111 = vsyncadd [#allocation4], 4294967264 }
  0x26   :  { %58 = vsyncpa [#allocation3], 1 }
  0x27   :  { %59 = vsyncpa [#allocation4], 1 }

</bundles_post_ra>
